<compile_context>
chip_gen: v7x
topology: tpu7x:2x2x1
jax: 0.10.0
libtpu: 0.0.40
codegen_flags: <defaults>
</compile_context>

<pallas_src>
import functools

import jax
import jax.numpy as jnp
from jax.experimental import pallas as pl
from jax.experimental.pallas import tpu as pltpu

# ----------------------------- model config ---------------------------------
DEPTH = 4          # => DEPTH - 2 = 2 hidden layers
WIDTH = 32
INPUT_DIM = 1      # kernel specializes the embedding to INPUT_DIM == 1
OUTPUT_DIM = 1     # kernel specializes the head to OUTPUT_DIM == 1
N = 512            # batch of collocation points
TM = 256           # batch tile on the lane axis (multiple of 128)

# params_dict of the PyTorch module only feeds the PDE-parameter machinery
# (with_param=False path); it never enters forward() -> plain constant here.
PARAMS_DICT = {"D": 1.0}


def _dense_mlp_kernel(n_hidden,
                      x_ref, w_in_ref, b_in_ref,
                      w_hid_ref, b_hid_ref,
                      w_out_ref, b_out_ref,
                      o_ref):
    # Feature-major activations: h is (WIDTH, TM), batch on lanes.
    #
    # Embedding (INPUT_DIM == 1): x @ W_in + b is an outer product -> VPU
    # broadcast-multiply instead of a K=1 MXU matmul.
    x = x_ref[...]                                         # (1, TM)
    h = jnp.tanh(w_in_ref[...] * x + b_in_ref[...])        # (WIDTH, TM)

    # Hidden layers: (WIDTH, WIDTH) @ (WIDTH, TM) MXU matmuls, lane-dense out.
    for i in range(n_hidden):                              # static unroll
        h = jnp.dot(w_hid_ref[i], h, preferred_element_type=jnp.float32)
        h = jnp.tanh(h + b_hid_ref[i])

    # Output layer (OUTPUT_DIM == 1): sublane reduction instead of an N=1 MXU
    # matmul; the result is already a lane-dense (1, TM) row.
    u = jnp.sum(w_out_ref[...] * h, axis=0, keepdims=True)  # (1, TM)
    o_ref[...] = (u + b_out_ref[...]).astype(o_ref.dtype)


def densenet_forward(x, params, tm=TM):
    """x: (n, INPUT_DIM) float32 -> (n, OUTPUT_DIM) float32."""
    w_in, b_in, w_hid, b_hid, w_out, b_out = params
    n_hidden = w_hid.shape[0]
    n = x.shape[0]

    # Feature-major (lane-dense) layouts for the kernel.
    x_t = x.T                                    # (INPUT_DIM, n)
    w_in_t = w_in.T                              # (WIDTH, INPUT_DIM)
    b_in_t = b_in.T                              # (WIDTH, 1)
    w_hid_t = jnp.swapaxes(w_hid, 1, 2)          # (H, WIDTH, WIDTH): W^T per layer
    b_hid_t = jnp.swapaxes(b_hid, 1, 2)          # (H, WIDTH, 1)
    # w_out (WIDTH, OUTPUT_DIM) and b_out (1, OUTPUT_DIM) used as-is.

    # Pad the batch to a multiple of the tile so arbitrary n is supported.
    n_blocks = -(-n // tm)
    n_pad = n_blocks * tm
    if n_pad != n:
        x_t = jnp.pad(x_t, ((0, 0), (0, n_pad - n)))

    kernel = functools.partial(_dense_mlp_kernel, n_hidden)

    flops = 2 * n_pad * WIDTH * (INPUT_DIM + n_hidden * WIDTH + OUTPUT_DIM)
    transcendentals = n_pad * WIDTH * (n_hidden + 1)
    bytes_accessed = 4 * (x_t.size + w_in.size + b_in.size + w_hid.size
                          + b_hid.size + w_out.size + b_out.size
                          + OUTPUT_DIM * n_pad)

    out = pl.pallas_call(
        kernel,
        out_shape=jax.ShapeDtypeStruct((OUTPUT_DIM, n_pad), jnp.float32),
        grid_spec=pltpu.PrefetchScalarGridSpec(
            num_scalar_prefetch=0,
            grid=(n_blocks,),
            in_specs=[
                pl.BlockSpec((INPUT_DIM, tm), lambda i: (0, i)),
                pl.BlockSpec((WIDTH, INPUT_DIM), lambda i: (0, 0)),
                pl.BlockSpec((WIDTH, 1), lambda i: (0, 0)),
                pl.BlockSpec((n_hidden, WIDTH, WIDTH), lambda i: (0, 0, 0)),
                pl.BlockSpec((n_hidden, WIDTH, 1), lambda i: (0, 0, 0)),
                pl.BlockSpec((WIDTH, OUTPUT_DIM), lambda i: (0, 0)),
                pl.BlockSpec((1, OUTPUT_DIM), lambda i: (0, 0)),
            ],
            out_specs=pl.BlockSpec((OUTPUT_DIM, tm), lambda i: (0, i)),
        ),
        compiler_params=pltpu.CompilerParams(
            dimension_semantics=("parallel",)),
        cost_estimate=pl.CostEstimate(
            flops=flops,
            transcendentals=transcendentals,
            bytes_accessed=bytes_accessed),
    )(x_t, w_in_t, b_in_t, w_hid_t, b_hid_t, w_out, b_out)

    return out[:, :n].T                          # (n, OUTPUT_DIM)


def init_params(key):
    """Deterministic init mimicking torch.nn.Linear default (uniform +-1/sqrt(fan_in))."""
    def linear(k, fan_in, fan_out):
        k1, k2 = jax.random.split(k)
        bound = 1.0 / jnp.sqrt(fan_in)
        w = jax.random.uniform(k1, (fan_in, fan_out), jnp.float32, -bound, bound)
        b = jax.random.uniform(k2, (1, fan_out), jnp.float32, -bound, bound)
        return w, b

    keys = jax.random.split(key, DEPTH)
    w_in, b_in = linear(keys[0], INPUT_DIM, WIDTH)
    hid = [linear(keys[1 + i], WIDTH, WIDTH) for i in range(DEPTH - 2)]
    w_hid = jnp.stack([w for w, _ in hid], axis=0)          # (H, W, W)
    b_hid = jnp.stack([b for _, b in hid], axis=0)          # (H, 1, W)
    w_out, b_out = linear(keys[-1], WIDTH, OUTPUT_DIM)
    return w_in, b_in, w_hid, b_hid, w_out, b_out


def reference_forward(x, params):
    """Plain-JAX reference of the PyTorch forward (identity output_transform)."""
    w_in, b_in, w_hid, b_hid, w_out, b_out = params
    h = jnp.tanh(x @ w_in + b_in)
    for i in range(w_hid.shape[0]):
        h = jnp.tanh(h @ w_hid[i] + b_hid[i])
    return h @ w_out + b_out


if __name__ == "__main__":
    key = jax.random.PRNGKey(0)
    k_param, k_x = jax.random.split(key)

    params = init_params(k_param)
    x = jax.random.uniform(k_x, (N, INPUT_DIM), jnp.float32, -1.0, 1.0)

    forward = jax.jit(densenet_forward)
    u = forward(x, params)
    u = jax.block_until_ready(u)

    u_ref = reference_forward(x, params)
    assert u.shape == (N, OUTPUT_DIM)
    assert jnp.allclose(u, u_ref, atol=1e-5, rtol=1e-5), "mismatch vs reference"

    print("KERNEL_OK")
</pallas_src>

<mosaic_0001>
module attributes {stable_mosaic.version = 11 : i64} {
  func.func @_dense_mlp_kernel(%arg0: i32, %arg1: memref<1x256xf32, #tpu.memory_space<vmem>>, %arg2: memref<32x1xf32, #tpu.memory_space<vmem>>, %arg3: memref<32x1xf32, #tpu.memory_space<vmem>>, %arg4: memref<2x32x32xf32, #tpu.memory_space<vmem>>, %arg5: memref<2x32x1xf32, #tpu.memory_space<vmem>>, %arg6: memref<32x1xf32, #tpu.memory_space<vmem>>, %arg7: memref<1x1xf32, #tpu.memory_space<vmem>>, %arg8: memref<1x256xf32, #tpu.memory_space<vmem>>) attributes {dimension_semantics = [#tpu.dimension_semantics<parallel>], iteration_bounds = array<i64: 2>, scalar_prefetch = 0 : i64, scratch_operands = 0 : i64, tpu.core_type = #tpu.core_type<tc>, window_params = [{transform_indices = @transform_0, window_bounds = array<i64: 1, 256>}, {pipeline_mode = #tpu.pipeline_mode<synchronous>, transform_indices = @transform_1, window_bounds = array<i64: 32, 1>}, {pipeline_mode = #tpu.pipeline_mode<synchronous>, transform_indices = @transform_2, window_bounds = array<i64: 32, 1>}, {pipeline_mode = #tpu.pipeline_mode<synchronous>, transform_indices = @transform_3, window_bounds = array<i64: 2, 32, 32>}, {pipeline_mode = #tpu.pipeline_mode<synchronous>, transform_indices = @transform_4, window_bounds = array<i64: 2, 32, 1>}, {pipeline_mode = #tpu.pipeline_mode<synchronous>, transform_indices = @transform_5, window_bounds = array<i64: 32, 1>}, {pipeline_mode = #tpu.pipeline_mode<synchronous>, transform_indices = @transform_6, window_bounds = array<i64: 1, 1>}, {transform_indices = @transform_7, window_bounds = array<i64: 1, 256>}]} {
    %c0 = arith.constant 0 : index
    %c0_0 = arith.constant 0 : index
    %0 = vector.load %arg1[%c0, %c0_0] : memref<1x256xf32, #tpu.memory_space<vmem>>, vector<1x256xf32>
    %c0_1 = arith.constant 0 : index
    %c0_2 = arith.constant 0 : index
    %1 = vector.load %arg2[%c0_1, %c0_2] : memref<32x1xf32, #tpu.memory_space<vmem>>, vector<32x1xf32>
    %2 = vector.broadcast %1 : vector<32x1xf32> to vector<32x256xf32>
    %3 = vector.broadcast %0 : vector<1x256xf32> to vector<32x256xf32>
    %4 = arith.mulf %2, %3 : vector<32x256xf32>
    %c0_3 = arith.constant 0 : index
    %c0_4 = arith.constant 0 : index
    %5 = vector.load %arg3[%c0_3, %c0_4] : memref<32x1xf32, #tpu.memory_space<vmem>>, vector<32x1xf32>
    %6 = vector.broadcast %5 : vector<32x1xf32> to vector<32x256xf32>
    %7 = arith.addf %4, %6 : vector<32x256xf32>
    %8 = math.tanh %7 : vector<32x256xf32>
    %c0_5 = arith.constant 0 : index
    %c0_6 = arith.constant 0 : index
    %c0_7 = arith.constant 0 : index
    %9 = vector.load %arg4[%c0_5, %c0_6, %c0_7] : memref<2x32x32xf32, #tpu.memory_space<vmem>>, vector<1x32x32xf32>
    %10 = vector.shape_cast %9 : vector<1x32x32xf32> to vector<32x32xf32>
    %cst = arith.constant dense<0.000000e+00> : vector<32x256xf32>
    %11 = tpu.matmul %10, %8, %cst {dimension_numbers = #tpu.dot_dimension_numbers<[1], [0], [0], [1], [0, 0, 1, 1], [], []>} : vector<32x32xf32>, vector<32x256xf32>, vector<32x256xf32> -> vector<32x256xf32>
    %c0_8 = arith.constant 0 : index
    %c0_9 = arith.constant 0 : index
    %c0_10 = arith.constant 0 : index
    %12 = vector.load %arg5[%c0_8, %c0_9, %c0_10] : memref<2x32x1xf32, #tpu.memory_space<vmem>>, vector<1x32x1xf32>
    %13 = vector.shape_cast %12 : vector<1x32x1xf32> to vector<32x1xf32>
    %14 = vector.broadcast %13 : vector<32x1xf32> to vector<32x256xf32>
    %15 = arith.addf %11, %14 : vector<32x256xf32>
    %16 = math.tanh %15 : vector<32x256xf32>
    %c1 = arith.constant 1 : index
    %c0_11 = arith.constant 0 : index
    %c0_12 = arith.constant 0 : index
    %17 = vector.load %arg4[%c1, %c0_11, %c0_12] : memref<2x32x32xf32, #tpu.memory_space<vmem>>, vector<1x32x32xf32>
    %18 = vector.shape_cast %17 : vector<1x32x32xf32> to vector<32x32xf32>
    %cst_13 = arith.constant dense<0.000000e+00> : vector<32x256xf32>
    %19 = tpu.matmul %18, %16, %cst_13 {dimension_numbers = #tpu.dot_dimension_numbers<[1], [0], [0], [1], [0, 0, 1, 1], [], []>} : vector<32x32xf32>, vector<32x256xf32>, vector<32x256xf32> -> vector<32x256xf32>
    %c1_14 = arith.constant 1 : index
    %c0_15 = arith.constant 0 : index
    %c0_16 = arith.constant 0 : index
    %20 = vector.load %arg5[%c1_14, %c0_15, %c0_16] : memref<2x32x1xf32, #tpu.memory_space<vmem>>, vector<1x32x1xf32>
    %21 = vector.shape_cast %20 : vector<1x32x1xf32> to vector<32x1xf32>
    %22 = vector.broadcast %21 : vector<32x1xf32> to vector<32x256xf32>
    %23 = arith.addf %19, %22 : vector<32x256xf32>
    %24 = math.tanh %23 : vector<32x256xf32>
    %c0_17 = arith.constant 0 : index
    %c0_18 = arith.constant 0 : index
    %25 = vector.load %arg6[%c0_17, %c0_18] : memref<32x1xf32, #tpu.memory_space<vmem>>, vector<32x1xf32>
    %26 = vector.broadcast %25 : vector<32x1xf32> to vector<32x256xf32>
    %27 = arith.mulf %26, %24 : vector<32x256xf32>
    %cst_19 = arith.constant dense<0.000000e+00> : vector<256xf32>
    %28 = vector.multi_reduction <add>, %27, %cst_19 [0] : vector<32x256xf32> to vector<256xf32>
    %29 = vector.shape_cast %28 : vector<256xf32> to vector<1x256xf32>
    %c0_20 = arith.constant 0 : index
    %c0_21 = arith.constant 0 : index
    %30 = vector.load %arg7[%c0_20, %c0_21] : memref<1x1xf32, #tpu.memory_space<vmem>>, vector<1x1xf32>
    %31 = vector.broadcast %30 : vector<1x1xf32> to vector<1x256xf32>
    %32 = arith.addf %29, %31 : vector<1x256xf32>
    %c0_22 = arith.constant 0 : index
    %c0_23 = arith.constant 0 : index
    %33 = vector.load %arg8[%c0_22, %c0_23] : memref<1x256xf32, #tpu.memory_space<vmem>>, vector<1x256xf32>
    tpu.vector_store %arg8[%c0_22, %c0_23], %32 {strides = array<i32>} : memref<1x256xf32, #tpu.memory_space<vmem>>, vector<1x256xf32>,
    return
  }
  func.func @transform_0(%arg0: i32) -> (i32, i32) {
    %c0_i32 = arith.constant 0 : i32
    %c0_i32_0 = arith.constant 0 : i32
    return %c0_i32, %arg0 : i32, i32
  }
  func.func @transform_1(%arg0: i32) -> (i32, i32) {
    %c0_i32 = arith.constant 0 : i32
    %c0_i32_0 = arith.constant 0 : i32
    %c0_i32_1 = arith.constant 0 : i32
    return %c0_i32, %c0_i32_0 : i32, i32
  }
  func.func @transform_2(%arg0: i32) -> (i32, i32) {
    %c0_i32 = arith.constant 0 : i32
    %c0_i32_0 = arith.constant 0 : i32
    %c0_i32_1 = arith.constant 0 : i32
    return %c0_i32, %c0_i32_0 : i32, i32
  }
  func.func @transform_3(%arg0: i32) -> (i32, i32, i32) {
    %c0_i32 = arith.constant 0 : i32
    %c0_i32_0 = arith.constant 0 : i32
    %c0_i32_1 = arith.constant 0 : i32
    %c0_i32_2 = arith.constant 0 : i32
    return %c0_i32, %c0_i32_0, %c0_i32_1 : i32, i32, i32
  }
  func.func @transform_4(%arg0: i32) -> (i32, i32, i32) {
    %c0_i32 = arith.constant 0 : i32
    %c0_i32_0 = arith.constant 0 : i32
    %c0_i32_1 = arith.constant 0 : i32
    %c0_i32_2 = arith.constant 0 : i32
    return %c0_i32, %c0_i32_0, %c0_i32_1 : i32, i32, i32
  }
  func.func @transform_5(%arg0: i32) -> (i32, i32) {
    %c0_i32 = arith.constant 0 : i32
    %c0_i32_0 = arith.constant 0 : i32
    %c0_i32_1 = arith.constant 0 : i32
    return %c0_i32, %c0_i32_0 : i32, i32
  }
  func.func @transform_6(%arg0: i32) -> (i32, i32) {
    %c0_i32 = arith.constant 0 : i32
    %c0_i32_0 = arith.constant 0 : i32
    %c0_i32_1 = arith.constant 0 : i32
    return %c0_i32, %c0_i32_0 : i32, i32
  }
  func.func @transform_7(%arg0: i32) -> (i32, i32) {
    %c0_i32 = arith.constant 0 : i32
    %c0_i32_0 = arith.constant 0 : i32
    return %c0_i32, %arg0 : i32, i32
  }
}

</mosaic_0001>

<bundles_post_ra>
// kernel: densenet_forward.1
= control target key start
LH: loop header
LB: loop body
LE: loop exit
PB: predicated region body
PF: predicated region fallthrough
CT: control target
= control target key end

     0   :  { %s1253_s0 = inlined_call_operand.vmem [shape: f32[1,512], index: 0, kind: input, shape index: {}]   ;;  %s1254_s1 = inlined_call_operand.vmem [shape: f32[32,1], index: 1, kind: input, shape index: {}]   ;;  %s1255_s2 = inlined_call_operand.vmem [shape: f32[32,1], index: 2, kind: input, shape index: {}]   ;;  %s1256_s3 = inlined_call_operand.vmem [shape: f32[2,32,32], index: 3, kind: input, shape index: {}]   ;;  %s1257_s4 = inlined_call_operand.vmem [shape: f32[2,32,1], index: 4, kind: input, shape index: {}]   ;;  %s1258_s5 = inlined_call_operand.vmem [shape: f32[32,1], index: 5, kind: input, shape index: {}]   ;;  %s1259_s6 = inlined_call_operand.<no memory space> [shape: f32[1,1], index: 6, kind: input, shape index: {}]   ;;  %s1260_s7 = inlined_call_operand.hbm [shape: f32[1,512], index: 7, kind: output, shape index: {}]  }
   0x1   :  { %v12_v0 = vstv %s1259_s6 }
   0x2   :  { %13 = vst [vmem:[#allocation2] sm:$0x1] %v12_v0 }
   0x3   :  { %14 = vsyncpa [#allocation4], 0 }
   0x4   :  { %16 = vsyncpa [#allocation4 + $0x1], 0  ;;  %s1043_s26 = smov 0   ;;  %s1045_s27 = smov 0  }
   0x5   :  { %s1047_s28 = smov 0   ;;  %s1049_s29 = smov 0  }
   0x6 LB: > { %s1064_s6 = sadd.s32 4294967295, %s994_s29   ;;  %s796_s30 = sadd.s32 4294967294, %s994_s29   ;;  %s994_s29 = sphi %s1049_s29, %s1266_s29   ;;  %s990_s28 = sphi %s1047_s28, %s1265_s28   ;;  %s986_s27 = sphi %s1045_s27, %s1264_s27   ;;  %s982_s26 = sphi %s1043_s26, %s1263_s26  }
   0x7   : > { %s1068_s8 = sadd.s32 1, %s994_s29   ;;  %s181_s9 = sadd.s32 1, %s990_s28 }
   0x8   : > { %s178_s10 = ssub.s32 %s994_s29, %s1068_s8  ;;  %p191_p0 = scmp.ne.s32.totalorder %s990_s28, %s986_s27 }
   0x9   : > { %p179_p1 = scmp.eq.s32.totalorder %s178_s10, 0  ;;  %p192_p2 = scmp.eq.s32.totalorder %s1064_s6, 1 }
   0xa   : > { %p197_p3 = scmp.ne.s32.totalorder %s986_s27, %s982_s26  ;;  %p198_p4 = scmp.eq.s32.totalorder %s796_s30, 1 }
   0xb   : > { %s1079_s11 = scalar_select %p179_p1, %s990_s28, %s181_s9  }
   0xc   : > { %p1081_p5 = por %p192_p2, %p191_p0  ;;  %p1085_p6 = por %p198_p4, %p197_p3 }
   0xd   : > { %p799_p7 = scmp.ge.s32.totalorder %s994_s29, 1  ;;  %p242_p8 = scmp.lt.s32.totalorder %s994_s29, 3 }
   0xf   : > { %p243_p9 = pnand %p799_p7, %p242_p8 }
  0x10   : > { %v323_v1 = vld [vmem:[%s1255_s2] sm:$0xff] (!%p243_p9)  ;;  %v996_v3 = vmov (!%p243_p9), 0   ;;  %v324_v4 = vld [vmem:[%s1255_s2 + $0x8] sm:$0xff] (!%p243_p9)  ;;  %v283_v6 = vld [vmem:[%s1254_s1 + $0x18] sm:$0xff] (!%p243_p9)  ;;  %v997_v22 = vmov (!%p243_p9), 0.0   ;;  %s801_s24 = sshll.u32 (!%p243_p9), %s1064_s6, 1  ;;  %v305_v24 = vlaneseq (!%p243_p9) }
  0x11   : > { %246 = sbr.rel (%p243_p9) target bundleno = 700 (0x2bc), region = 48  ;;  %v280_v2 = vld [vmem:[%s1254_s1] sm:$0xff] (!%p243_p9)  ;;  %883 = vset.pattern.permute.xlu1 (!%p243_p9), %v996_v3  ;;  %882 = vset.pattern.permute.xlu0 (!%p243_p9), %v996_v3  ;;  %v281_v5 = vld [vmem:[%s1254_s1 + $0x8] sm:$0xff] (!%p243_p9)  ;;  %v282_v7 = vld [vmem:[%s1254_s1 + $0x10] sm:$0xff] (!%p243_p9)  ;;  %p274_p10 = scmp.lt.s32.totalorder (!%p243_p9), %s801_s24, 3  ;;  %vm391_vm0 = vcmask (!%p243_p9), 261120  }
  0x12   : > { %329 = vperm.xlu1 (!%p243_p9), %883, %v323_v1   ;;  %286 = vperm.xlu0 (!%p243_p9), %882, %v280_v2   ;;  %v326_v8 = vld [vmem:[%s1255_s2 + $0x18] sm:$0xff] (!%p243_p9)  ;;  %v325_v9 = vld [vmem:[%s1255_s2 + $0x10] sm:$0xff] (!%p243_p9)  ;;  %v368_v10 = vld [vmem:[%s1257_s4 + $0x8] sm:$0xff] (!%p243_p9)  ;;  %v1155_v25 = vshrl.u32 (!%p243_p9), %v305_v24, 7  ;;  %s270_s14 = sand.u32 (!%p243_p9), 1, %s986_s27   ;;  %s823_s16 = sshll.u32 (!%p243_p9), %s1064_s6, 5 }
  0x13   : > { %v367_v11 = vld [vmem:[%s1257_s4] sm:$0xff] (!%p243_p9)  ;;  %v370_v12 = vld [vmem:[%s1257_s4 + $0x18] sm:$0xff] (!%p243_p9)  ;;  %v369_v13 = vld [vmem:[%s1257_s4 + $0x10] sm:$0xff] (!%p243_p9)  ;;  %468 = vmatprep.mubr.f32.mxu0 (!%p243_p9), %v997_v22  ;;  %607 = vmatprep.mubr.f32.mxu1 (!%p243_p9), %v997_v22  ;;  %s800_s15 = sshll.u32 (!%p243_p9), %s270_s14, 1  ;;  %vm722_vm1 = vcmp.lt.s32.totalorder (!%p243_p9), %v305_v24, 256  ;;  %s1211_s21 = scalar_lea.hbm (!%p243_p9), %s1260_s7, %s823_s16 }
  0x14   : > { %v811_v14 = vld [vmem:[%s1257_s4 + $0x28] sm:$0xff] (!%p243_p9)  ;;  %v810_v15 = vld [vmem:[%s1257_s4 + $0x20] sm:$0xff] (!%p243_p9)  ;;  %v813_v16 = vld [vmem:[%s1257_s4 + $0x38] sm:$0xff] (!%p243_p9)  ;;  %v307_v26 = vsub.s32 (!%p243_p9), 0, %v1155_v25  ;;  %v311_v27 = vsub.s32 (!%p243_p9), 1, %v1155_v25  ;;  %s272_s17 = scalar_lea.vmem (!%p243_p9), [#allocation3], %s800_s15 }
  0x15   : > { %v812_v17 = vld [vmem:[%s1257_s4 + $0x30] sm:$0xff] (!%p243_p9)  ;;  %v641_v18 = vld [vmem:[%s1258_s5 + $0x8] sm:$0xff] (!%p243_p9)  ;;  %v640_v19 = vld [vmem:[%s1258_s5] sm:$0xff] (!%p243_p9)  ;;  %s740_s18 = sshll.u32 (!%p243_p9), %s272_s17, 4  ;;  %s726_s22 = scalar_lea.sflag (!%p243_p9), [#allocation4], %s270_s14  ;;  %s1213_s18 = int_to_ptr.vmem [resolvable:$true] %s740_s18 }
  0x16   : > { %334 = vperm.xlu1 (!%p243_p9), %883, %v324_v4   ;;  %291 = vperm.xlu0 (!%p243_p9), %882, %v281_v5   ;;  %v643_v20 = vld [vmem:[%s1258_s5 + $0x18] sm:$0xff] (!%p243_p9)  ;;  %v642_v21 = vld [vmem:[%s1258_s5 + $0x10] sm:$0xff] (!%p243_p9)  ;;  %v690_v23 = vld [vmem:[#allocation2] sm:$0x1] (!%p243_p9)  ;;  %s932_s23 = scalar_lea.vmem (!%p243_p9), %s1213_s18, 32  ;;  %s999_s6 = smov (!%p243_p9), [#allocation3]  }
  0x17   : > { %v363_v3 = vld [vmem:[%s1256_s3] sm:$0xff] (!%p243_p9)  ;;  %v364_v4 = vld [vmem:[%s1256_s3 + $0x8] sm:$0xff] (!%p243_p9)  ;;  %v365_v5 = vld [vmem:[%s1256_s3 + $0x10] sm:$0xff] (!%p243_p9)  ;;  %p933_p11 = scmp.ne.s32.totalorder (!%p243_p9), %s1213_s18, %s932_s23 }
  0x18   : > { %s1268_s24 = smov (!%p274_p10, %s801_s24), 3 }
  0x19   : > { %s276_s9 = scalar_lea.vmem %s1253_s0, %s1268_s24  ;;  %p934_p12 = pnand %p933_p11, %p1081_p5 }
  0x1a   : > { %301 = vperm.xlu1 %883, %v283_v6   ;;  %296 = vperm.xlu0 %882, %v282_v7   ;;  %v279_v28 = vld [vmem:[%s276_s9] sm:$0x3]  ;;  %v366_v6 = vld [vmem:[%s1256_s3 + $0x18] sm:$0xff]  ;;  %s936_s24 = sshll.u32 %s999_s6, 4  ;;  %s937_s24 = int_to_ptr.vmem [resolvable:$false] %s936_s24 }
  0x1b   : > { %v308_v29 = vrot.slane %v279_v28, %v307_v26  ;;  %v312_v30 = vrot.slane %v279_v28, %v311_v27  ;;  %p935_p13 = pneg %p934_p12  ;;  %s938_s25 = scalar_lea.vmem %s937_s24, 64 }
  0x1c   : > { %p939_p0 = scmp.lt.s32.totalorder %s1213_s18, %s937_s24  ;;  %p940_p1 = scmp.lt.s32.totalorder %s938_s25, %s932_s23 }
  0x1e   : > { %344 = vperm.xlu1 %883, %v326_v8   ;;  %339 = vperm.xlu0 %882, %v325_v9   ;;  %p941_p2 = por %p940_p1, %p939_p0 }
  0x20   : > { %p942_p3 = pnand %p941_p2, %p935_p13 }
  0x22   : > { %378 = vperm.xlu1 %883, %v368_v10   ;;  %373 = vperm.xlu0 %882, %v367_v11  }
  0x26   : > { %388 = vperm.xlu1 %883, %v370_v12   ;;  %383 = vperm.xlu0 %882, %v369_v13  }
  0x2a   : > { %518 = vperm.xlu1 %883, %v811_v14   ;;  %513 = vperm.xlu0 %882, %v810_v15  }
  0x2e   : > { %528 = vperm.xlu1 %883, %v813_v16   ;;  %523 = vperm.xlu0 %882, %v812_v17  }
  0x32   : > { %651 = vperm.xlu1 %883, %v641_v18   ;;  %646 = vperm.xlu0 %882, %v640_v19  }
  0x36   : > { %661 = vperm.xlu1 %883, %v643_v20   ;;  %656 = vperm.xlu0 %882, %v642_v21  }
  0x3a   : > { %693 = vperm.xlu0 %882, %v690_v23  }
  0x91   : > { %v330_v31 = vpop.permute.xlu1 %329  ;;  %v287_v32 = vpop.permute.xlu0 %286 }
  0x92   : > { %v315_v33 = vmul.f32 %v308_v29, %v287_v32  ;;  %v316_v34 = vmul.f32 %v312_v30, %v287_v32 }
  0x94   : > { %v347_v35 = vadd.f32 %v330_v31, %v315_v33  ;;  %v348_v36 = vadd.f32 %v330_v31, %v316_v34 }
  0x95   : > { %v335_v37 = vpop.permute.xlu1 %334  ;;  %v292_v38 = vpop.permute.xlu0 %291 }
  0x96   : > { %v317_v39 = vmul.f32 %v308_v29, %v292_v38  ;;  %v318_v40 = vmul.f32 %v312_v30, %v292_v38  ;;  %884 = vtanh.f32 %v347_v35 }
  0x97   : > { %886 = vtanh.f32 %v348_v36 }
  0x98   : > { %v349_v41 = vadd.f32 %v335_v37, %v317_v39  ;;  %v350_v42 = vadd.f32 %v335_v37, %v318_v40 }
  0x99   : > { %v302_v43 = vpop.permute.xlu1 %301  ;;  %v297_v44 = vpop.permute.xlu0 %296 }
  0x9a   : > { %888 = vtanh.f32 %v349_v41  ;;  %v321_v45 = vmul.f32 %v308_v29, %v302_v43  ;;  %v322_v46 = vmul.f32 %v312_v30, %v302_v43  ;;  %v319_v47 = vmul.f32 %v308_v29, %v297_v44  ;;  %v806_v43 = vld [vmem:[%s1256_s3 + $0x20] sm:$0xff] }
  0x9b   : > { %890 = vtanh.f32 %v350_v42  ;;  %v320_v48 = vmul.f32 %v312_v30, %v297_v44  ;;  %v807_v44 = vld [vmem:[%s1256_s3 + $0x28] sm:$0xff] }
  0x9d   : > { %v345_v49 = vpop.permute.xlu1 %344  ;;  %v340_v50 = vpop.permute.xlu0 %339 }
  0x9e   : > { %v353_v51 = vadd.f32 %v345_v49, %v321_v45  ;;  %v354_v52 = vadd.f32 %v345_v49, %v322_v46  ;;  %v351_v53 = vadd.f32 %v340_v50, %v319_v47  ;;  %v352_v54 = vadd.f32 %v340_v50, %v320_v48  ;;  %v808_v45 = vld [vmem:[%s1256_s3 + $0x30] sm:$0xff]  ;;  %v809_v46 = vld [vmem:[%s1256_s3 + $0x38] sm:$0xff] }
  0xa0   : > { %892 = vtanh.f32 %v353_v51  ;;  %v885_v55 = vpop.eup %884 }
  0xa1   : > { %894 = vtanh.f32 %v354_v52  ;;  %v887_v56 = vpop.eup %886  ;;  %v374_v7 = vpop.permute.xlu0 %373 }
  0xa2   : > { %896 = vtanh.f32 %v351_v53  ;;  %v379_v12 = vpop.permute.xlu1 %378 }
  0xa3   : > { %898 = vtanh.f32 %v352_v54 }
  0xa4   : > { %v889_v57 = vpop.eup %888 }
  0xa5   : > { %v891_v58 = vpop.eup %890  ;;  %v826_v59 = vpack.c.bf16 %v889_v57, %v885_v55  ;;  %v384_v17 = vpop.permute.xlu0 %383 }
  0xa6   : > { %v824_v60 = vpack.c.bf16 %v891_v58, %v887_v56  ;;  %v389_v23 = vpop.permute.xlu1 %388 }
  0xa8   : > { %825 = vmatprep.subr.bf16.mxu0 %v824_v60 }
  0xa9   : > { %827 = vmatpush1.bf16.msra.mxu0 %v826_v59  ;;  %v514_v47 = vpop.permute.xlu0 %513 }
  0xaa   : > { %v893_v61 = vpop.eup %892  ;;  %v519_v52 = vpop.permute.xlu1 %518 }
  0xab   : > { %v895_v62 = vpop.eup %894 }
  0xac   : > { %v897_v63 = vpop.eup %896 }
  0xad   : > { %v899_v0 = vpop.eup %898  ;;  %v830_v1 = vpack.c.bf16 %v893_v61, %v897_v63 }
  0xae   : > { %v828_v2 = vpack.c.bf16 %v895_v62, %v899_v0  ;;  %v529_v61 = vpop.permute.xlu1 %528 }
  0xb0   : > { %829 = vmatprep.subr.bf16.mxu0 %v828_v2 }
  0xb1   : > { %831 = vmatpush1.bf16.msra.mxu0 %v830_v1 }
  0xb4   : > { %802 = vmatmul.mubr.msk.f32.vlgmr.msra.gmra.mrb[0].mxu0 %vm391_vm0, %v363_v3 }
  0xb5   : > { %474 = vmatprep.mubr.f32.mxu0 %v997_v22 }
  0xb8   : > { %803 = vmatmul.mubr.msk.f32.gmra.mrb[2].mxu0 %vm391_vm0, %v364_v4 }
  0xb9   : > { %480 = vmatprep.mubr.f32.mxu0 %v997_v22 }
  0xbc   : > { %804 = vmatmul.mubr.msk.f32.gmra.mrb[4].mxu0 %vm391_vm0, %v365_v5 }
  0xbd   : > { %486 = vmatprep.mubr.f32.mxu0 %v997_v22 }
  0xc0   : > { %805 = vmatmul.mubr.msk.f32.gmra.mrb[6].mxu0 %vm391_vm0, %v366_v6  ;;  %v652_v6 = vpop.permute.xlu1 %651 }
 0x187   : > { %v470_v8 = vpop.f32.mrb[0].mxu0 }
 0x188   : > { %v471_v9 = vadd.f32 %v470_v8, %v374_v7  ;;  %v472_v10 = vpop.f32.mrb[1].mxu0 }
 0x189   : > { %v473_v11 = vadd.f32 %v472_v10, %v374_v7 }
 0x18a   : > { %900 = vtanh.f32 %v471_v9 }
 0x18b   : > { %v476_v13 = vpop.f32.mrb[2].mxu0  ;;  %902 = vtanh.f32 %v473_v11 }
 0x18c   : > { %v477_v14 = vadd.f32 %v476_v13, %v379_v12  ;;  %v478_v15 = vpop.f32.mrb[3].mxu0 }
 0x18d   : > { %v479_v16 = vadd.f32 %v478_v15, %v379_v12 }
 0x18e   : > { %904 = vtanh.f32 %v477_v14 }
 0x18f   : > { %906 = vtanh.f32 %v479_v16  ;;  %v482_v18 = vpop.f32.mrb[4].mxu0 }
 0x190   : > { %v483_v19 = vadd.f32 %v482_v18, %v384_v17  ;;  %v484_v20 = vpop.f32.mrb[5].mxu0 }
 0x191   : > { %v485_v21 = vadd.f32 %v484_v20, %v384_v17 }
 0x192   : > { %908 = vtanh.f32 %v483_v19 }
 0x193   : > { %v488_v27 = vpop.f32.mrb[6].mxu0  ;;  %910 = vtanh.f32 %v485_v21  ;;  %v662_v21 = vpop.permute.xlu1 %661 }
 0x194   : > { %v489_v28 = vadd.f32 %v488_v27, %v389_v23  ;;  %v490_v29 = vpop.f32.mrb[7].mxu0  ;;  %v901_v31 = vpop.eup %900 }
 0x195   : > { %v491_v30 = vadd.f32 %v490_v29, %v389_v23  ;;  %v903_v32 = vpop.eup %902 }
 0x196   : > { %912 = vtanh.f32 %v489_v28 }
 0x197   : > { %914 = vtanh.f32 %v491_v30 }
 0x198   : > { %v905_v33 = vpop.eup %904 }
 0x199   : > { %v907_v34 = vpop.eup %906  ;;  %v834_v35 = vpack.c.bf16 %v905_v33, %v901_v31 }
 0x19a   : > { %v832_v36 = vpack.c.bf16 %v907_v34, %v903_v32 }
 0x19c   : > { %833 = vmatprep.subr.bf16.mxu1 %v832_v36  ;;  %v909_v37 = vpop.eup %908 }
 0x19d   : > { %835 = vmatpush1.bf16.msra.mxu1 %v834_v35  ;;  %v911_v38 = vpop.eup %910 }
 0x1a0   : > { %v913_v39 = vpop.eup %912 }
 0x1a1   : > { %v915_v40 = vpop.eup %914  ;;  %v838_v41 = vpack.c.bf16 %v913_v39, %v909_v37 }
 0x1a2   : > { %v836_v42 = vpack.c.bf16 %v915_v40, %v911_v38  ;;  %v998_v38 = vmov 1966171168  }
 0x1a3   : > { %v706_v39 = vunpack.c.l.s4 %v998_v38 }
 0x1a4   : > { %837 = vmatprep.subr.bf16.mxu1 %v836_v42 }
 0x1a5   : > { %839 = vmatpush1.bf16.msra.mxu1 %v838_v41 }
 0x1a8   : > { %814 = vmatmul.mubr.msk.f32.vlgmr.msra.gmra.mrb[0].mxu1 %vm391_vm0, %v806_v43 }
 0x1a9   : > { %613 = vmatprep.mubr.f32.mxu1 %v997_v22 }
 0x1ac   : > { %815 = vmatmul.mubr.msk.f32.gmra.mrb[2].mxu1 %vm391_vm0, %v807_v44 }
 0x1ad   : > { %619 = vmatprep.mubr.f32.mxu1 %v997_v22 }
 0x1b0   : > { %816 = vmatmul.mubr.msk.f32.gmra.mrb[4].mxu1 %vm391_vm0, %v808_v45  ;;  %v707_v45 = vunpack.c.0.s8 %v706_v39 }
 0x1b1   : > { %625 = vmatprep.mubr.f32.mxu1 %v997_v22  ;;  %v524_v22 = vpop.permute.xlu0 %523 }
 0x1b4   : > { %817 = vmatmul.mubr.msk.f32.gmra.mrb[6].mxu1 %vm391_vm0, %v809_v46 }
 0x1b5   : > { %v647_v3 = vpop.permute.xlu0 %646 }
 0x1b9   : > { %v657_v14 = vpop.permute.xlu0 %656 }
 0x1bd   : > { %v694_v41 = vpop.permute.xlu0 %693 }
 0x1be   : > { %v699_v46 = vrot.slane %v694_v41, %v307_v26 }
 0x27b   : > { %v609_v48 = vpop.f32.mrb[0].mxu1 }
 0x27c   : > { %v610_v49 = vadd.f32 %v609_v48, %v514_v47  ;;  %v611_v50 = vpop.f32.mrb[1].mxu1 }
 0x27d   : > { %v612_v51 = vadd.f32 %v611_v50, %v514_v47 }
 0x27e   : > { %916 = vtanh.f32 %v610_v49 }
 0x27f   : > { %v615_v53 = vpop.f32.mrb[2].mxu1  ;;  %918 = vtanh.f32 %v612_v51  ;;  %v710_v51 = vsub.s32 %v707_v45, %v1155_v25 }
 0x280   : > { %v616_v54 = vadd.f32 %v615_v53, %v519_v52  ;;  %v617_v55 = vpop.f32.mrb[3].mxu1 }
 0x281   : > { %v618_v56 = vadd.f32 %v617_v55, %v519_v52 }
 0x282   : > { %920 = vtanh.f32 %v616_v54 }
 0x283   : > { %922 = vtanh.f32 %v618_v56  ;;  %v621_v57 = vpop.f32.mrb[4].mxu1 }
 0x284   : > { %v622_v58 = vadd.f32 %v621_v57, %v524_v22  ;;  %v623_v59 = vpop.f32.mrb[5].mxu1 }
 0x285   : > { %v624_v60 = vadd.f32 %v623_v59, %v524_v22 }
 0x286   : > { %924 = vtanh.f32 %v622_v58 }
 0x287   : > { %926 = vtanh.f32 %v624_v60  ;;  %v627_v62 = vpop.f32.mrb[6].mxu1 }
 0x288   : > { %v628_v63 = vadd.f32 %v627_v62, %v529_v61  ;;  %v629_v0 = vpop.f32.mrb[7].mxu1  ;;  %v917_v2 = vpop.eup %916 }
 0x289   : > { %v630_v1 = vadd.f32 %v629_v0, %v529_v61  ;;  %v919_v4 = vpop.eup %918  ;;  %v664_v8 = vmul.f32 %v917_v2, %v647_v3 }
 0x28a   : > { %928 = vtanh.f32 %v628_v63  ;;  %v665_v10 = vmul.f32 %v919_v4, %v647_v3 }
 0x28b   : > { %930 = vtanh.f32 %v630_v1 }
 0x28c   : > { %v921_v5 = vpop.eup %920 }
 0x28d   : > { %v923_v7 = vpop.eup %922  ;;  %v666_v9 = vmul.f32 %v921_v5, %v652_v6 }
 0x28e   : > { %v667_v11 = vmul.f32 %v923_v7, %v652_v6 }
 0x28f   : > { %v672_v12 = vadd.f32 %v666_v9, %v664_v8 }
 0x290   : > { %v925_v13 = vpop.eup %924  ;;  %v681_v15 = vadd.f32 %v667_v11, %v665_v10 }
 0x291   : > { %v927_v16 = vpop.eup %926  ;;  %v668_v17 = vmul.f32 %v925_v13, %v657_v14 }
 0x292   : > { %v669_v18 = vmul.f32 %v927_v16, %v657_v14 }
 0x293   : > { %v673_v19 = vadd.f32 %v672_v12, %v668_v17 }
 0x294   : > { %v929_v20 = vpop.eup %928  ;;  %v682_v23 = vadd.f32 %v681_v15, %v669_v18 }
 0x295   : > { %v931_v27 = vpop.eup %930  ;;  %v670_v28 = vmul.f32 %v929_v20, %v662_v21 }
 0x296   : > { %v671_v29 = vmul.f32 %v931_v27, %v662_v21 }
 0x297   : > { %v674_v30 = vadd.f32 %v673_v19, %v670_v28 }
 0x298   : > { %v683_v31 = vadd.f32 %v682_v23, %v671_v29 }
 0x299   : > { %v675_v32 = vrot.slane %v674_v30, 4 }
 0x29a   : > { %v684_v33 = vrot.slane %v683_v31, 4 }
 0x29b   : > { %v676_v34 = vadd.f32 %v675_v32, %v674_v30 }
 0x29c   : > { %v685_v35 = vadd.f32 %v684_v33, %v683_v31 }
 0x29d   : > { %v677_v36 = vrot.slane %v676_v34, 2 }
 0x29e   : > { %v686_v37 = vrot.slane %v685_v35, 2 }
 0x29f   : > { %v678_v40 = vadd.f32 %v677_v36, %v676_v34 }
 0x2a0   : > { %v687_v42 = vadd.f32 %v686_v37, %v685_v35 }
 0x2a1   : > { %v679_v43 = vrot.slane %v678_v40, 1 }
 0x2a2   : > { %v688_v44 = vrot.slane %v687_v42, 1 }
 0x2a3   : > { %v680_v47 = vadd.f32 %v679_v43, %v678_v40 }
 0x2a4   : > { %v689_v48 = vadd.f32 %v688_v44, %v687_v42 }
 0x2a5   : > { %v700_v49 = vadd.f32 %v699_v46, %v680_v47 }
 0x2a6   : > { %v701_v50 = vadd.f32 %v699_v46, %v689_v48 }
 0x2a8   : > { %v704_v52 = vcombine.low %v700_v49, %v701_v50 }
 0x2aa   : > { %v711_v53 = vrot.slane %v704_v52, %v710_v51 }
 0x2ac   : > { %v718_v54 = vrot.slane %v711_v53, %v710_v51 }
 0x2ae   : > { %724 = vst.msk [vmem:[%s272_s17] sm:$0x3] %vm722_vm1, %v718_v54 }
 0x2af   : > { %945 = shalt.err (!%p942_p3)
}
 0x2b0   : > { %s946_s30 = scalar_lea.hbm %s1211_s21, 32  ;;  %s950_s14 = scalar_lea.hbm %s1260_s7, 64 }
 0x2b1   : > { %p947_p4 = scmp.ne.s32.totalorder %s1211_s21, %s946_s30  ;;  %p951_p9 = scmp.lt.u32.totalorder %s1211_s21, %s1260_s7 }
 0x2b2   : > { %p952_p10 = scmp.lt.u32.totalorder %s950_s14, %s946_s30  ;;  %p954_p12 = scmp.lt.u32.totalorder %s946_s30, %s1211_s21 }
 0x2b3   : > { %p948_p7 = pnand %p947_p4, %p1081_p5 }
 0x2b4   : > { %p953_p11 = por %p952_p10, %p951_p9 }
 0x2b5   : > { %p949_p8 = pneg %p948_p7 }
 0x2b6   : > { %p955_p13 = por %p954_p12, %p953_p11 }
 0x2b8   : > { %p956_p0 = pnand %p955_p13, %p949_p8 }
 0x2ba   : > { %959 = shalt.err (!%p956_p0)
}
 0x2bb   : > { %840 = dma.vmem_to_hbm [thread:$0]  (%p1081_p5), %s1213_s18, 32, %s1211_s21, %s726_s22  }
 0x2bc PF: > { %p846_p1 = scmp.ge.s32.totalorder %s994_s29, 2  ;;  %s752_s17 = sand.u32 1, %s982_s26  }
 0x2bd   : > { %s753_s19 = scalar_lea.sflag [#allocation4], %s752_s17 }
 0x2be   : > { %p843_p2 = pnand %p846_p1, %p1085_p6 }
 0x2c0   : > { %977 = dma.done.wait (!%p843_p2), %s753_s19, 32  }
 0x2c1   : > { %979 = vsyncadd (!%p843_p2), %s753_s19, 4294967264  ;;  %p19_p3 = scmp.ge.s32.totalorder %s1068_s8, 4   ;;  %s1263_s26 = smov %s986_s27 }
 0x2c2   : > { %s1264_s27 = smov %s990_s28  ;;  %s1265_s28 = smov %s1079_s11 }
 0x2c3   : > { %s1266_s29 = smov %s1068_s8  ;;  %21 = sbr.rel (!%p19_p3) target bundleno = 6 (0x6), region = 85 }
 0x2ca   :  { %758 = vsyncpa [#allocation4], 1 }
 0x2cb   :  { %760 = vsyncpa [#allocation4 + $0x1], 1 }

</bundles_post_ra>
